<compile_context>
chip_gen: v7x
topology: tpu7x:2x2x1
jax: 0.10.0
libtpu: 0.0.40
codegen_flags: <defaults>
</compile_context>

<pallas_src>
import functools

import jax
import jax.numpy as jnp
from jax.experimental import pallas as pl
from jax.experimental.pallas import tpu as pltpu


def _round_up(x: int, m: int) -> int:
    return ((x + m - 1) // m) * m


def _ode_mlp_kernel(z_ref, w1_ref, b1_ref, w2_ref, b2_ref, out_ref,
                    *, backwards: bool):
    """One row-tile of the ODE-func MLP: grad = tanh(z W1 + b1) W2 + b2."""
    z = z_ref[...]                                                  # [bm, Dp]
    h = jnp.dot(z, w1_ref[...], preferred_element_type=jnp.float32)
    h = jnp.tanh(h + b1_ref[...].astype(jnp.float32))               # [bm, Hp] f32
    g = jnp.dot(h.astype(w2_ref.dtype), w2_ref[...],
                preferred_element_type=jnp.float32)
    g = g + b2_ref[...].astype(jnp.float32)                         # [bm, Dp] f32
    if backwards:
        g = -g
    out_ref[...] = g.astype(out_ref.dtype)


def graph_ode_func(t_local, z, params, backwards: bool = False,
                   block_rows: int = 256):
    """JAX/Pallas equivalent of GraphODEFunc.forward.

    t_local is accepted (and ignored), exactly as in the PyTorch module.
    z: [batch, n_nodes, latent_dim]
    params: dict with w1 [D, H], b1 [H], w2 [H, D], b2 [D]
    block_rows: packed-row tile size (each packed row = `pack` original rows).
    """
    del t_local  # forward does not use the time point
    B, N, D = z.shape
    w1, b1, w2, b2 = params["w1"], params["b1"], params["w2"], params["b2"]
    H = w1.shape[1]
    M = B * N

    # Lane packing: fold `pack` consecutive latent rows into the 128-lane axis
    # so all streamed arrays are lane-dense (no masked vst / wasted vregs).
    if D < 128 and (128 % D == 0) and (M % (128 // D) == 0):
        pack = 128 // D
    else:
        pack = 1  # fallback: original (possibly lane-sparse) layout

    Dp, Hp, Mp = pack * D, pack * H, M // pack
    z2 = z.reshape(Mp, Dp)  # row-major view in HBM, no data movement

    if pack > 1:
        # Block-diagonal weights act independently on each packed row chunk.
        eye1 = jnp.eye(pack, dtype=w1.dtype)
        eye2 = jnp.eye(pack, dtype=w2.dtype)
        w1p = jnp.kron(eye1, w1)                # [Dp, Hp]
        w2p = jnp.kron(eye2, w2)                # [Hp, Dp]
        b1p = jnp.tile(b1, pack).reshape(1, Hp)
        b2p = jnp.tile(b2, pack).reshape(1, Dp)
    else:
        w1p, w2p = w1, w2
        b1p, b2p = b1.reshape(1, H), b2.reshape(1, D)

    # Large row tiles (multiple of 8 for f32 sublanes), clamped for tiny inputs.
    bm = min(block_rows, _round_up(Mp, 8))
    bm = max(8, (bm // 8) * 8)
    grid = (pl.cdiv(Mp, bm),)

    itemsize = jnp.dtype(z.dtype).itemsize
    cost = pl.CostEstimate(
        flops=4 * Mp * Dp * Hp,
        transcendentals=Mp * Hp,
        bytes_accessed=int(2 * Mp * Dp * itemsize
                           + (w1p.size + w2p.size + b1p.size + b2p.size)
                           * jnp.dtype(w1.dtype).itemsize),
    )

    grad2 = pl.pallas_call(
        functools.partial(_ode_mlp_kernel, backwards=backwards),
        out_shape=jax.ShapeDtypeStruct((Mp, Dp), z.dtype),
        grid_spec=pltpu.PrefetchScalarGridSpec(
            num_scalar_prefetch=0,
            grid=grid,
            in_specs=[
                pl.BlockSpec((bm, Dp), lambda i: (i, 0)),   # z rows (streamed)
                pl.BlockSpec((Dp, Hp), lambda i: (0, 0)),   # W1 (VMEM-resident)
                pl.BlockSpec((1, Hp), lambda i: (0, 0)),    # b1
                pl.BlockSpec((Hp, Dp), lambda i: (0, 0)),   # W2 (VMEM-resident)
                pl.BlockSpec((1, Dp), lambda i: (0, 0)),    # b2
            ],
            out_specs=pl.BlockSpec((bm, Dp), lambda i: (i, 0)),
        ),
        compiler_params=pltpu.CompilerParams(
            dimension_semantics=("parallel",)),
        cost_estimate=cost,
    )(z2, w1p, b1p, w2p, b2p)

    return grad2.reshape(B, N, D)


def init_params(key, latent_dim: int, hidden_dim: int):
    """Deterministic synthetic parameters (stand-in for nn.Linear weights)."""
    k1, k2, k3, k4 = jax.random.split(key, 4)
    scale1 = 1.0 / jnp.sqrt(latent_dim)
    scale2 = 1.0 / jnp.sqrt(hidden_dim)
    return {
        "w1": jax.random.uniform(k1, (latent_dim, hidden_dim), jnp.float32,
                                 -scale1, scale1),
        "b1": jax.random.uniform(k2, (hidden_dim,), jnp.float32,
                                 -scale1, scale1),
        "w2": jax.random.uniform(k3, (hidden_dim, latent_dim), jnp.float32,
                                 -scale2, scale2),
        "b2": jax.random.uniform(k4, (latent_dim,), jnp.float32,
                                 -scale2, scale2),
    }


if __name__ == "__main__":
    key = jax.random.PRNGKey(0)
    kz, kp = jax.random.split(key)

    batch, n_nodes, latent_dim, hidden_dim = 2, 8, 32, 64
    z = jax.random.normal(kz, (batch, n_nodes, latent_dim), jnp.float32)
    params = init_params(kp, latent_dim, hidden_dim)
    t_local = jnp.float32(0.5)

    grad = graph_ode_func(t_local, z, params, backwards=False)
    grad = jax.block_until_ready(grad)

    # Pure-JAX reference for a correctness check.
    z2d = z.reshape(-1, latent_dim)
    ref = jnp.tanh(z2d @ params["w1"] + params["b1"]) @ params["w2"] + params["b2"]
    ref = ref.reshape(batch, n_nodes, latent_dim)
    assert grad.shape == z.shape and grad.dtype == z.dtype
    assert jnp.allclose(grad, ref, atol=1e-5, rtol=1e-5)

    # backwards=True path (negated gradient)
    grad_bwd = jax.block_until_ready(
        graph_ode_func(t_local, z, params, backwards=True))
    assert jnp.allclose(grad_bwd, -ref, atol=1e-5, rtol=1e-5)

    # TODO(synk): nfe counter / set_graph are Python-side bookkeeping in the
    # PyTorch module (no tensor compute) and are intentionally not modeled.
    print("KERNEL_OK")
</pallas_src>

<mosaic_0001>
module attributes {stable_mosaic.version = 11 : i64} {
  func.func @_ode_mlp_kernel(%arg0: i32, %arg1: memref<8x128xf32, #tpu.memory_space<vmem>>, %arg2: memref<128x256xf32, #tpu.memory_space<vmem>>, %arg3: memref<1x256xf32, #tpu.memory_space<vmem>>, %arg4: memref<256x128xf32, #tpu.memory_space<vmem>>, %arg5: memref<1x128xf32, #tpu.memory_space<vmem>>, %arg6: memref<8x128xf32, #tpu.memory_space<vmem>>) attributes {dimension_semantics = [#tpu.dimension_semantics<parallel>], iteration_bounds = array<i64: 1>, scalar_prefetch = 0 : i64, scratch_operands = 0 : i64, tpu.core_type = #tpu.core_type<tc>, window_params = [{transform_indices = @transform_0, window_bounds = array<i64: 8, 128>}, {pipeline_mode = #tpu.pipeline_mode<synchronous>, transform_indices = @transform_1, window_bounds = array<i64: 128, 256>}, {pipeline_mode = #tpu.pipeline_mode<synchronous>, transform_indices = @transform_2, window_bounds = array<i64: 1, 256>}, {pipeline_mode = #tpu.pipeline_mode<synchronous>, transform_indices = @transform_3, window_bounds = array<i64: 256, 128>}, {pipeline_mode = #tpu.pipeline_mode<synchronous>, transform_indices = @transform_4, window_bounds = array<i64: 1, 128>}, {transform_indices = @transform_5, window_bounds = array<i64: 8, 128>}]} {
    %c0 = arith.constant 0 : index
    %c0_0 = arith.constant 0 : index
    %0 = vector.load %arg1[%c0, %c0_0] : memref<8x128xf32, #tpu.memory_space<vmem>>, vector<8x128xf32>
    %c0_1 = arith.constant 0 : index
    %c0_2 = arith.constant 0 : index
    %1 = vector.load %arg2[%c0_1, %c0_2] : memref<128x256xf32, #tpu.memory_space<vmem>>, vector<128x256xf32>
    %cst = arith.constant dense<0.000000e+00> : vector<8x256xf32>
    %2 = tpu.matmul %0, %1, %cst {dimension_numbers = #tpu.dot_dimension_numbers<[1], [0], [0], [1], [0, 0, 1, 1], [], []>} : vector<8x128xf32>, vector<128x256xf32>, vector<8x256xf32> -> vector<8x256xf32>
    %c0_3 = arith.constant 0 : index
    %c0_4 = arith.constant 0 : index
    %3 = vector.load %arg3[%c0_3, %c0_4] : memref<1x256xf32, #tpu.memory_space<vmem>>, vector<1x256xf32>
    %4 = vector.broadcast %3 : vector<1x256xf32> to vector<8x256xf32>
    %5 = arith.addf %2, %4 : vector<8x256xf32>
    %6 = math.tanh %5 : vector<8x256xf32>
    %c0_5 = arith.constant 0 : index
    %c0_6 = arith.constant 0 : index
    %7 = vector.load %arg4[%c0_5, %c0_6] : memref<256x128xf32, #tpu.memory_space<vmem>>, vector<256x128xf32>
    %cst_7 = arith.constant dense<0.000000e+00> : vector<8x128xf32>
    %8 = tpu.matmul %6, %7, %cst_7 {dimension_numbers = #tpu.dot_dimension_numbers<[1], [0], [0], [1], [0, 0, 1, 1], [], []>} : vector<8x256xf32>, vector<256x128xf32>, vector<8x128xf32> -> vector<8x128xf32>
    %c0_8 = arith.constant 0 : index
    %c0_9 = arith.constant 0 : index
    %9 = vector.load %arg5[%c0_8, %c0_9] : memref<1x128xf32, #tpu.memory_space<vmem>>, vector<1x128xf32>
    %10 = vector.broadcast %9 : vector<1x128xf32> to vector<8x128xf32>
    %11 = arith.addf %8, %10 : vector<8x128xf32>
    %c0_10 = arith.constant 0 : index
    %c0_11 = arith.constant 0 : index
    %12 = vector.load %arg6[%c0_10, %c0_11] : memref<8x128xf32, #tpu.memory_space<vmem>>, vector<8x128xf32>
    tpu.vector_store %arg6[%c0_10, %c0_11], %11 {strides = array<i32>} : memref<8x128xf32, #tpu.memory_space<vmem>>, vector<8x128xf32>,
    return
  }
  func.func @transform_0(%arg0: i32) -> (i32, i32) {
    %c0_i32 = arith.constant 0 : i32
    %c0_i32_0 = arith.constant 0 : i32
    return %arg0, %c0_i32 : i32, i32
  }
  func.func @transform_1(%arg0: i32) -> (i32, i32) {
    %c0_i32 = arith.constant 0 : i32
    %c0_i32_0 = arith.constant 0 : i32
    %c0_i32_1 = arith.constant 0 : i32
    return %c0_i32, %c0_i32_0 : i32, i32
  }
  func.func @transform_2(%arg0: i32) -> (i32, i32) {
    %c0_i32 = arith.constant 0 : i32
    %c0_i32_0 = arith.constant 0 : i32
    %c0_i32_1 = arith.constant 0 : i32
    return %c0_i32, %c0_i32_0 : i32, i32
  }
  func.func @transform_3(%arg0: i32) -> (i32, i32) {
    %c0_i32 = arith.constant 0 : i32
    %c0_i32_0 = arith.constant 0 : i32
    %c0_i32_1 = arith.constant 0 : i32
    return %c0_i32, %c0_i32_0 : i32, i32
  }
  func.func @transform_4(%arg0: i32) -> (i32, i32) {
    %c0_i32 = arith.constant 0 : i32
    %c0_i32_0 = arith.constant 0 : i32
    %c0_i32_1 = arith.constant 0 : i32
    return %c0_i32, %c0_i32_0 : i32, i32
  }
  func.func @transform_5(%arg0: i32) -> (i32, i32) {
    %c0_i32 = arith.constant 0 : i32
    %c0_i32_0 = arith.constant 0 : i32
    return %arg0, %c0_i32 : i32, i32
  }
}

</mosaic_0001>

<bundles_post_ra>
// kernel: tpu_custom_call.1
= control target key start
LH: loop header
LB: loop body
LE: loop exit
PB: predicated region body
PF: predicated region fallthrough
CT: control target
= control target key end

     0   :  { %10 = vsyncpa [#allocation3], 0  ;;  %s618_s0 = inlined_call_operand.hbm [shape: f32[4,128], index: 0, kind: input, shape index: {}]   ;;  %s619_s1 = inlined_call_operand.hbm [shape: f32[128,256], index: 1, kind: input, shape index: {}]   ;;  %s620_s2 = inlined_call_operand.vmem [shape: f32[1,256], index: 2, kind: input, shape index: {}]   ;;  %s621_s3 = inlined_call_operand.hbm [shape: f32[256,128], index: 3, kind: input, shape index: {}]   ;;  %s622_s4 = inlined_call_operand.vmem [shape: f32[1,128], index: 4, kind: input, shape index: {}]   ;;  %s623_s5 = inlined_call_operand.hbm [shape: f32[4,128], index: 5, kind: output, shape index: {}]  }
   0x1   :  { %11 = vsyncpa [#allocation6], 0 }
   0x2   :  { %12 = vsyncpa [#allocation4], 0 }
   0x3   :  { %17 = vsyncadd [#allocation3], 64  ;;  %s517_s18 = smov [#allocation5]   ;;  %s423_s22 = scalar_lea.hbm %s619_s1, 4096 }
   0x4   :  { %s30_s19 = sshll.u32 %s517_s18, 4  ;;  %p424_p0 = scmp.ne.s32.totalorder %s619_s1, %s423_s22  ;;  %s31_s19 = int_to_ptr.vmem [resolvable:$true] %s30_s19 }
   0x5   :  { %p427_p1 = scmp.lt.u32.totalorder %s423_s22, %s619_s1 }
   0x7   :  { %p429_p2 = pnand %p427_p1, %p424_p0 }
   0x9   :  { %432 = shalt.err (!%p429_p2)
}
   0xa   :  { %s433_s27 = scalar_lea.vmem %s31_s19, 4096  ;;  %p438_p4 = scmp.lt.s32.totalorder %s31_s19, %s31_s19 }
   0xb   :  { %p434_p3 = scmp.ne.s32.totalorder %s31_s19, %s433_s27  ;;  %p439_p5 = scmp.lt.s32.totalorder %s433_s27, %s433_s27 }
   0xd   :  { %p440_p6 = por %p439_p5, %p438_p4 }
   0xf   :  { %p441_p7 = pnand %p440_p6, %p434_p3 }
  0x11   :  { %444 = shalt.err (!%p441_p7)
}
  0x12   :  { %s518_s28 = smov 256   ;;  %s519_s29 = smov 16  }
  0x13   :  { %36 = dma.hbm_to_vmem [thread:$0]  %s619_s1, 4096, %s31_s19, [#allocation6], %s518_s28, %s518_s28, %s519_s29  }
  0x14   :  { %s520_s7 = smov [#allocation2]   ;;  %s445_s11 = scalar_lea.hbm %s618_s0, 64 }
  0x15   :  { %s18_s8 = sshll.u32 %s520_s7, 4  ;;  %p446_p8 = scmp.ne.s32.totalorder %s618_s0, %s445_s11  ;;  %s19_s8 = int_to_ptr.vmem [resolvable:$true] %s18_s8 }
  0x16   :  { %p449_p9 = scmp.lt.u32.totalorder %s445_s11, %s618_s0 }
  0x18   :  { %p451_p10 = pnand %p449_p9, %p446_p8 }
  0x1a   :  { %454 = shalt.err (!%p451_p10)
}
  0x1b   :  { %s455_s16 = scalar_lea.vmem %s19_s8, 64  ;;  %s459_s1 = scalar_lea.vmem %s19_s8, 128 }
  0x1c   :  { %p456_p11 = scmp.ne.s32.totalorder %s19_s8, %s455_s16  ;;  %p460_p12 = scmp.lt.s32.totalorder %s19_s8, %s19_s8 }
  0x1d   :  { %p461_p13 = scmp.lt.s32.totalorder %s459_s1, %s455_s16 }
  0x1f   :  { %p462_p0 = por %p461_p13, %p460_p12 }
  0x21   :  { %p463_p1 = pnand %p462_p0, %p456_p11 }
  0x23   :  { %466 = shalt.err (!%p463_p1)
}
  0x24   :  { %s521_s17 = smov 64   ;;  %s522_s18 = smov 4  }
  0x25   :  { %24 = dma.hbm_to_vmem [thread:$0]  %s618_s0, 64, %s19_s8, [#allocation3], %s521_s17, %s521_s17, %s522_s18  }
  0x26   :  { %s523_s21 = smov [#allocation7]   ;;  %s467_s25 = scalar_lea.hbm %s621_s3, 4096 }
  0x27   :  { %s44_s22 = sshll.u32 %s523_s21, 4  ;;  %p468_p2 = scmp.ne.s32.totalorder %s621_s3, %s467_s25  ;;  %s45_s22 = int_to_ptr.vmem [resolvable:$true] %s44_s22 }
  0x28   :  { %p471_p3 = scmp.lt.u32.totalorder %s467_s25, %s621_s3 }
  0x2a   :  { %p473_p4 = pnand %p471_p3, %p468_p2 }
  0x2c   :  { %476 = shalt.err (!%p473_p4)
}
  0x2d   :  { %s477_s30 = scalar_lea.vmem %s45_s22, 4096  ;;  %p482_p6 = scmp.lt.s32.totalorder %s45_s22, %s45_s22 }
  0x2e   :  { %p478_p5 = scmp.ne.s32.totalorder %s45_s22, %s477_s30  ;;  %p483_p7 = scmp.lt.s32.totalorder %s477_s30, %s477_s30 }
  0x30   :  { %p484_p8 = por %p483_p7, %p482_p6 }
  0x32   :  { %p485_p9 = pnand %p484_p8, %p478_p5 }
  0x34   :  { %488 = shalt.err (!%p485_p9)
}
  0x35   :  { %s524_s0 = smov 128   ;;  %s525_s6 = smov 8  }
  0x36   :  { %50 = dma.hbm_to_vmem [thread:$0]  %s621_s3, 4096, %s45_s22, [#allocation6], %s524_s0, %s524_s0, %s525_s6  }
  0x37   :  { %511 = dma.done.wait [#allocation3], 128  }
  0x38   :  { %512 = vsyncadd [#allocation3], 4294967168 }
  0x39   :  { %513 = dma.done.wait [#allocation6], 8192  }
  0x3a   :  { %514 = vsyncadd [#allocation6], 4294959104  ;;  %v526_v0 = vmov 0.0   ;;  %v64_v1 = vld [vmem:[#allocation5 + $0x8] sm:$0xff]  ;;  %v66_v2 = vld [vmem:[#allocation5 + $0x18] sm:$0xff] }
  0x3b   :  { %171 = vmatprep.mubr.f32.mxu0 %v526_v0  ;;  %v63_v3 = vld [vmem:[#allocation5] sm:$0xff]  ;;  %v344_v4 = vpack.c.bf16 %v66_v2, %v64_v1  ;;  %v65_v5 = vld [vmem:[#allocation5 + $0x10] sm:$0xff]  ;;  %v68_v6 = vld [vmem:[#allocation5 + $0x28] sm:$0xff] }
  0x3c   :  { %v70_v7 = vld [vmem:[#allocation5 + $0x38] sm:$0xff]  ;;  %v346_v8 = vpack.c.bf16 %v65_v5, %v63_v3  ;;  %v67_v10 = vld [vmem:[#allocation5 + $0x20] sm:$0xff]  ;;  %v69_v11 = vld [vmem:[#allocation5 + $0x30] sm:$0xff] }
  0x3d   :  { %v348_v9 = vpack.c.bf16 %v70_v7, %v68_v6  ;;  %v72_v12 = vld [vmem:[#allocation5 + $0x48] sm:$0xff]  ;;  %345 = vmatprep.subr.bf16.mxu0 %v344_v4  ;;  %v74_v13 = vld [vmem:[#allocation5 + $0x58] sm:$0xff]  ;;  %v350_v14 = vpack.c.bf16 %v69_v11, %v67_v10  ;;  %v71_v16 = vld [vmem:[#allocation5 + $0x40] sm:$0xff] }
  0x3e   :  { %347 = vmatpush1.bf16.msra.mxu0 %v346_v8  ;;  %v352_v15 = vpack.c.bf16 %v74_v13, %v72_v12  ;;  %v73_v17 = vld [vmem:[#allocation5 + $0x50] sm:$0xff]  ;;  %v76_v18 = vld [vmem:[#allocation5 + $0x68] sm:$0xff]  ;;  %v78_v19 = vld [vmem:[#allocation5 + $0x78] sm:$0xff] }
  0x3f   :  { %349 = vmatprep.subr.bf16.mxu0 %v348_v9  ;;  %v354_v20 = vpack.c.bf16 %v73_v17, %v71_v16  ;;  %v356_v21 = vpack.c.bf16 %v78_v19, %v76_v18  ;;  %v75_v22 = vld [vmem:[#allocation5 + $0x60] sm:$0xff]  ;;  %v77_v23 = vld [vmem:[#allocation5 + $0x70] sm:$0xff]  ;;  %v80_v24 = vld [vmem:[#allocation5 + $0x88] sm:$0xff] }
  0x40   :  { %v82_v25 = vld [vmem:[#allocation5 + $0x98] sm:$0xff]  ;;  %v79_v26 = vld [vmem:[#allocation5 + $0x80] sm:$0xff]  ;;  %v81_v27 = vld [vmem:[#allocation5 + $0x90] sm:$0xff]  ;;  %v358_v31 = vpack.c.bf16 %v77_v23, %v75_v22 }
  0x41   :  { %v196_v28 = vld [vmem:[#allocation7 + $0x80] sm:$0xff]  ;;  %v197_v29 = vld [vmem:[#allocation7 + $0x88] sm:$0xff]  ;;  %v198_v34 = vld [vmem:[#allocation7 + $0x90] sm:$0xff]  ;;  %v360_v36 = vpack.c.bf16 %v82_v25, %v80_v24  ;;  %v362_v46 = vpack.c.bf16 %v81_v27, %v79_v26 }
  0x42   :  { %351 = vmatpush1.bf16.msra.mxu0 %v350_v14  ;;  %v180_v30 = vld [vmem:[#allocation7] sm:$0xff]  ;;  %v376_v32 = vpack.c.bf16 %v197_v29, %v196_v28  ;;  %v181_v33 = vld [vmem:[#allocation7 + $0x8] sm:$0xff]  ;;  %v199_v35 = vld [vmem:[#allocation7 + $0x98] sm:$0xff] }
  0x43   :  { %353 = vmatprep.subr.bf16.mxu0 %v352_v15  ;;  %v378_v37 = vpack.c.bf16 %v181_v33, %v180_v30  ;;  %v380_v38 = vpack.c.bf16 %v199_v35, %v198_v34  ;;  %v182_v39 = vld [vmem:[#allocation7 + $0x10] sm:$0xff]  ;;  %v183_v40 = vld [vmem:[#allocation7 + $0x18] sm:$0xff]  ;;  %v200_v41 = vld [vmem:[#allocation7 + $0xa0] sm:$0xff]  ;;  %v97_v34 = vlaneseq }
  0x44   :  { %v84_v42 = vld [vmem:[#allocation5 + $0xa8] sm:$0xff]  ;;  %v86_v43 = vld [vmem:[#allocation5 + $0xb8] sm:$0xff]  ;;  %377 = vmatprep.subr.bf16.mxu1 %v376_v32  ;;  %v382_v45 = vpack.c.bf16 %v183_v40, %v182_v39  ;;  %v83_v47 = vld [vmem:[#allocation5 + $0xa0] sm:$0xff] }
  0x45   :  { %v201_v44 = vld [vmem:[#allocation7 + $0xa8] sm:$0xff]  ;;  %379 = vmatpush3.bf16.msra.mxu1 %v378_v37  ;;  %v184_v49 = vld [vmem:[#allocation7 + $0x20] sm:$0xff]  ;;  %v364_v51 = vpack.c.bf16 %v86_v43, %v84_v42  ;;  %v85_v52 = vld [vmem:[#allocation5 + $0xb0] sm:$0xff]  ;;  %v98_v35 = vshrl.u32 %v97_v34, 7 }
  0x46   :  { %355 = vmatpush1.bf16.msra.mxu0 %v354_v20  ;;  %381 = vmatprep.subr.bf16.mxu1 %v380_v38  ;;  %v384_v48 = vpack.c.bf16 %v201_v44, %v200_v41  ;;  %v185_v50 = vld [vmem:[#allocation7 + $0x28] sm:$0xff]  ;;  %v202_v53 = vld [vmem:[#allocation7 + $0xb0] sm:$0xff]  ;;  %v203_v54 = vld [vmem:[#allocation7 + $0xb8] sm:$0xff]  ;;  %v366_v58 = vpack.c.bf16 %v85_v52, %v83_v47 }
  0x47   :  { %357 = vmatprep.subr.bf16.mxu0 %v356_v21  ;;  %v88_v55 = vld [vmem:[#allocation5 + $0xc8] sm:$0xff]  ;;  %v90_v56 = vld [vmem:[#allocation5 + $0xd8] sm:$0xff]  ;;  %v386_v57 = vpack.c.bf16 %v185_v50, %v184_v49  ;;  %v388_v59 = vpack.c.bf16 %v203_v54, %v202_v53  ;;  %v186_v60 = vld [vmem:[#allocation7 + $0x30] sm:$0xff]  ;;  %v103_v38 = vsub.s32 1, %v98_v35 }
  0x48   :  { %v187_v61 = vld [vmem:[#allocation7 + $0x38] sm:$0xff]  ;;  %v368_v62 = vpack.c.bf16 %v90_v56, %v88_v55  ;;  %v87_v63 = vld [vmem:[#allocation5 + $0xc0] sm:$0xff]  ;;  %v89_v0 = vld [vmem:[#allocation5 + $0xd0] sm:$0xff] }
  0x49   :  { %383 = vmatpush3.bf16.msra.mxu1 %v382_v45  ;;  %v92_v1 = vld [vmem:[#allocation5 + $0xe8] sm:$0xff]  ;;  %v94_v2 = vld [vmem:[#allocation5 + $0xf8] sm:$0xff]  ;;  %v390_v3 = vpack.c.bf16 %v187_v61, %v186_v60  ;;  %v370_v4 = vpack.c.bf16 %v89_v0, %v87_v63  ;;  %v91_v6 = vld [vmem:[#allocation5 + $0xe0] sm:$0xff] }
  0x4a   :  { %359 = vmatpush1.bf16.msra.mxu0 %v358_v31  ;;  %385 = vmatprep.subr.bf16.mxu1 %v384_v48  ;;  %v372_v5 = vpack.c.bf16 %v94_v2, %v92_v1  ;;  %v93_v7 = vld [vmem:[#allocation5 + $0xf0] sm:$0xff]  ;;  %v62_v9 = vld [vmem:[#allocation2] sm:$0xff]  ;;  %v204_v10 = vld [vmem:[#allocation7 + $0xc0] sm:$0xff] }
  0x4b   :  { %361 = vmatprep.subr.bf16.mxu0 %v360_v36  ;;  %v374_v8 = vpack.c.bf16 %v93_v7, %v91_v6  ;;  %v205_v11 = vld [vmem:[#allocation7 + $0xc8] sm:$0xff]  ;;  %v188_v13 = vld [vmem:[#allocation7 + $0x40] sm:$0xff]  ;;  %v206_v16 = vld [vmem:[#allocation7 + $0xd0] sm:$0xff]  ;;  %v99_v36 = vsub.s32 0, %v98_v35 }
  0x4c   :  { %v392_v12 = vpack.c.bf16 %v205_v11, %v204_v10  ;;  %v189_v14 = vld [vmem:[#allocation7 + $0x48] sm:$0xff]  ;;  %v207_v17 = vld [vmem:[#allocation7 + $0xd8] sm:$0xff]  ;;  %v190_v19 = vld [vmem:[#allocation7 + $0x50] sm:$0xff] }
  0x4d   :  { %387 = vmatpush3.bf16.msra.mxu1 %v386_v57  ;;  %v394_v15 = vpack.c.bf16 %v189_v14, %v188_v13  ;;  %v396_v18 = vpack.c.bf16 %v207_v17, %v206_v16  ;;  %v191_v20 = vld [vmem:[#allocation7 + $0x58] sm:$0xff]  ;;  %v208_v22 = vld [vmem:[#allocation7 + $0xe0] sm:$0xff]  ;;  %v209_v23 = vld [vmem:[#allocation7 + $0xe8] sm:$0xff] }
  0x4e   :  { %363 = vmatpush1.bf16.msra.mxu0 %v362_v46  ;;  %389 = vmatprep.subr.bf16.mxu1 %v388_v59  ;;  %v398_v21 = vpack.c.bf16 %v191_v20, %v190_v19  ;;  %v192_v24 = vld [vmem:[#allocation7 + $0x60] sm:$0xff]  ;;  %v400_v25 = vpack.c.bf16 %v209_v23, %v208_v22  ;;  %v193_v26 = vld [vmem:[#allocation7 + $0x68] sm:$0xff]  ;;  %v210_v27 = vld [vmem:[#allocation7 + $0xf0] sm:$0xff] }
  0x4f   :  { %365 = vmatprep.subr.bf16.mxu0 %v364_v51  ;;  %v211_v28 = vld [vmem:[#allocation7 + $0xf8] sm:$0xff]  ;;  %v402_v29 = vpack.c.bf16 %v193_v26, %v192_v24  ;;  %v194_v31 = vld [vmem:[#allocation7 + $0x70] sm:$0xff] }
  0x50   :  { %v404_v30 = vpack.c.bf16 %v211_v28, %v210_v27  ;;  %v195_v32 = vld [vmem:[#allocation7 + $0x78] sm:$0xff] }
  0x51   :  { %391 = vmatpush3.bf16.msra.mxu1 %v390_v3  ;;  %v406_v33 = vpack.c.bf16 %v195_v32, %v194_v31  ;;  %v95_v37 = vld [vmem:[%s620_s2] sm:$0x3] }
  0x52   :  { %367 = vmatpush1.bf16.msra.mxu0 %v366_v58  ;;  %393 = vmatprep.subr.bf16.mxu1 %v392_v12  ;;  %v100_v39 = vrot.slane %v95_v37, %v99_v36  ;;  %v104_v40 = vrot.slane %v95_v37, %v103_v38  ;;  %v308_v48 = vld [vmem:[%s622_s4] ss:$0 sm:$0xff] }
  0x53   :  { %369 = vmatprep.subr.bf16.mxu0 %v368_v62 }
  0x55   :  { %395 = vmatpush3.bf16.msra.mxu1 %v394_v15 }
  0x56   :  { %371 = vmatpush1.bf16.msra.mxu0 %v370_v4  ;;  %397 = vmatprep.subr.bf16.mxu1 %v396_v18 }
  0x57   :  { %373 = vmatprep.subr.bf16.mxu0 %v372_v5 }
  0x59   :  { %399 = vmatpush3.bf16.msra.mxu1 %v398_v21 }
  0x5a   :  { %375 = vmatpush1.bf16.msra.mxu0 %v374_v8  ;;  %401 = vmatprep.subr.bf16.mxu1 %v400_v25 }
  0x5d   :  { %172 = vmatmul.mubr.f32.vlgmr.msra.gmra.mrb[0].mxu0 %v62_v9  ;;  %403 = vmatpush3.bf16.msra.mxu1 %v402_v29 }
  0x5e   :  { %405 = vmatprep.subr.bf16.mxu1 %v404_v30 }
  0x61   :  { %407 = vmatpush3.bf16.msra.mxu1 %v406_v33 }
 0x130   :  { %v173_v41 = vpop.f32.mrb[0].mxu0 }
 0x131   :  { %v174_v42 = vadd.f32 %v173_v41, %v100_v39  ;;  %v175_v43 = vpop.f32.mrb[1].mxu0 }
 0x132   :  { %v176_v44 = vadd.f32 %v175_v43, %v104_v40 }
 0x134   :  { %419 = vtanh.f32 %v176_v44 }
 0x135   :  { %421 = vtanh.f32 %v174_v42 }
 0x13e   :  { %v420_v45 = vpop.eup %419 }
 0x13f   :  { %v422_v46 = vpop.eup %421  ;;  %283 = vmatprep.mubr.f32.mxu1 %v420_v45 }
 0x140   :  { %284 = vmatmul.mubr.f32.vlgmr.msra.gmra.mrb[0].mxu1 %v422_v46 }
 0x213   :  { %v341_v47 = vpop.f32.mrb[0].mxu1 }
 0x214   :  { %v342_v49 = vpop.f32.mrb[1].mxu1 }
 0x215   :  { %v343_v50 = vadd.f32 %v342_v49, %v341_v47 }
 0x217   :  { %v286_v51 = vadd.f32 %v343_v50, %v308_v48 }
 0x219   :  { %289 = vst [vmem:[#allocation8] sm:$0xff] %v286_v51 }
 0x21a   :  { %294 = vsyncadd [#allocation4], 64  ;;  %s527_s2 = smov [#allocation8]  }
 0x21b   :  { %s295_s12 = sshll.u32 %s527_s2, 4  ;;  %s296_s12 = int_to_ptr.vmem [resolvable:$true] %s295_s12 }
 0x21c   :  { %s489_s13 = scalar_lea.vmem %s296_s12, 64  ;;  %s493_s14 = scalar_lea.vmem %s296_s12, 128 }
 0x21d   :  { %p490_p10 = scmp.ne.s32.totalorder %s296_s12, %s489_s13  ;;  %p494_p11 = scmp.lt.s32.totalorder %s296_s12, %s296_s12 }
 0x21e   :  { %p495_p12 = scmp.lt.s32.totalorder %s493_s14, %s489_s13 }
 0x220   :  { %p496_p13 = por %p495_p12, %p494_p11 }
 0x222   :  { %p497_p0 = pnand %p496_p13, %p490_p10 }
 0x224   :  { %500 = shalt.err (!%p497_p0)
}
 0x225   :  { %s501_s4 = scalar_lea.hbm %s623_s5, 64 }
 0x226   :  { %p502_p1 = scmp.ne.s32.totalorder %s623_s5, %s501_s4  ;;  %p505_p2 = scmp.lt.u32.totalorder %s501_s4, %s623_s5 }
 0x228   :  { %p507_p3 = pnand %p505_p2, %p502_p1 }
 0x22a   :  { %510 = shalt.err (!%p507_p3)
}
 0x22b   :  { %301 = dma.vmem_to_hbm [thread:$0]  %s296_s12, 64, %s623_s5, [#allocation4], %s521_s17, %s521_s17, %s522_s18  }
 0x22c   :  { %515 = dma.done.wait [#allocation4], 128  }
 0x22d   :  { %516 = vsyncadd [#allocation4], 4294967168 }
 0x22e   :  { %305 = vsyncpa [#allocation3], 1 }
 0x22f   :  { %306 = vsyncpa [#allocation6], 1 }
 0x230   :  { %307 = vsyncpa [#allocation4], 1 }

</bundles_post_ra>
